<compile_context>
chip_gen: v6e
topology: v6e:2x2x1
jax: 0.10.0
libtpu: 0.0.40
codegen_flags: <defaults>
</compile_context>

<pallas_src>
import jax
import jax.numpy as jnp
from jax.experimental import pallas as pl
from jax.experimental.pallas import tpu as pltpu

LATENT_SIZE = 256
NUM_CLASSES = 3
NUM_PROTOTYPES = 4
PROTOTYPE_SIZE = 50
SLAB = 128                  # lane-dense output width (z in 0:50, outputs in 50:53)
EPS_INSTANCE_NORM = 1e-5    # nn.InstanceNorm1d default eps
EPS_PROTO = 1e-5            # self.epsilon


def _round_up(n, m):
    return ((n + m - 1) // m) * m


def _choose_tiling(B, block_b):
    """Pick a batch tile TB (multiple of 8) that minimizes padding and keeps the
    grid at >= 2 steps when possible (so both TensorCores are used on v7x)."""
    B8 = _round_up(B, 8)
    n_steps = pl.cdiv(B8, block_b)
    if n_steps < 2 and B8 >= 16:
        n_steps = 2
    TB = _round_up(pl.cdiv(B8, n_steps), 8)
    n_steps = pl.cdiv(B8, TB)
    return TB, n_steps, n_steps * TB


def ppnet_kernel(x_ref, w1_ref, b1_ref, w2_ref, b2_ref, protos_ref, out_ref):
    x = x_ref[...]                                                       # (TB, 256)

    # --- self.main: Linear(256 -> 50), output lanes padded to 128 (lanes 50: = 0) ---
    h = jnp.dot(x, w1_ref[...], preferred_element_type=jnp.float32) + b1_ref[...]   # (TB, 128)

    # --- InstanceNorm1d on a 2-D (TB, 50) input: per-row, biased var, no affine ---
    # Two-pass variance (matches reference numerics); padded lanes masked to 0 so
    # they contribute nothing and stay exactly 0 downstream.
    col = jax.lax.broadcasted_iota(jnp.int32, (1, SLAB), 1)              # (1, 128)
    lane_valid = col < PROTOTYPE_SIZE
    inv_d = 1.0 / PROTOTYPE_SIZE
    mean = jnp.sum(h, axis=-1, keepdims=True) * inv_d                    # (TB, 1)
    c = jnp.where(lane_valid, h - mean, 0.0)                             # centered, 0 in pad lanes
    var = jnp.sum(c * c, axis=-1, keepdims=True) * inv_d
    # --- normalize + ReLU (padded lanes remain exactly 0) ---
    h = jnp.maximum(c * jax.lax.rsqrt(var + EPS_INSTANCE_NORM), 0.0)

    # --- Linear(50 -> 50), zero-padded to (128,128): z lanes 50: are exactly 0 ---
    z = jnp.dot(h, w2_ref[...], preferred_element_type=jnp.float32) + b2_ref[...]   # (TB, 128)

    # --- __proto_layer_l2: direct squared differences, unrolled over the 4
    #     prototypes (no third MXU matmul, no distance-expansion cancellation).
    #     Padded lanes are 0 in both z and the padded prototypes. ---
    protos = protos_ref[...]                                             # (4, 128)
    acts = []
    for j in range(NUM_PROTOTYPES):
        d = z - protos[j:j + 1, :]                                       # (TB, 128)
        l2 = jnp.sum(d * d, axis=-1, keepdims=True)                      # (TB, 1)
        acts.append(jnp.log((l2 + 1.0) / (l2 + EPS_PROTO)))

    # --- self.linear (fixed custom weights, bias=False) folded into lane math:
    #     logits = [a1 - a0, a2, a3]; then __output_act_func (tanh, relu, relu) ---
    out0 = jnp.tanh(acts[1] - acts[0])                                   # (TB, 1)
    out1 = jnp.maximum(acts[2], 0.0)
    out2 = jnp.maximum(acts[3], 0.0)

    # --- assemble lane-dense output slab (z already occupies lanes 0:50,
    #     lanes 50: are zero) and store it with one wide unmasked write ---
    slab = jnp.where(col == PROTOTYPE_SIZE, out0, z)
    slab = jnp.where(col == PROTOTYPE_SIZE + 1, out1, slab)
    slab = jnp.where(col == PROTOTYPE_SIZE + 2, out2, slab)
    out_ref[...] = slab


def ppnet_forward(x, params, block_b=2048):
    """Returns (final_outputs (B,3), z (B,50)) like PPNet.forward."""
    B = x.shape[0]
    TB, n_steps, B_pad = _choose_tiling(B, block_b)
    if B_pad != B:
        x = jnp.pad(x, ((0, B_pad - B), (0, 0)))

    # Layout plumbing on the tiny weights (done once, outside the kernel): pad
    # everything to 128-lane / 128-K tiles with zeros so MXU operands sit on
    # native tile boundaries and padded lanes are exactly zero throughout.
    pad = SLAB - PROTOTYPE_SIZE
    w1p = jnp.pad(params["w1"], ((0, 0), (0, pad)))                    # (256, 128)
    b1p = jnp.pad(params["b1"], ((0, 0), (0, pad)))                    # (1, 128)
    w2p = jnp.pad(params["w2"], ((0, pad), (0, pad)))                  # (128, 128)
    b2p = jnp.pad(params["b2"], ((0, 0), (0, pad)))                    # (1, 128)
    protos_p = jnp.pad(params["protos"], ((0, 0), (0, pad)))           # (4, 128)

    cost = pl.CostEstimate(
        flops=2 * B_pad * (LATENT_SIZE * SLAB + SLAB * SLAB),
        transcendentals=10 * B_pad,          # rsqrt + 4 log + 4 recip + tanh per row
        bytes_accessed=B_pad * (LATENT_SIZE + SLAB) * 4,
    )

    slab = pl.pallas_call(
        ppnet_kernel,
        out_shape=jax.ShapeDtypeStruct((B_pad, SLAB), jnp.float32),
        grid=(n_steps,),
        in_specs=[
            pl.BlockSpec((TB, LATENT_SIZE), lambda i: (i, 0)),           # x (tiled)
            pl.BlockSpec((LATENT_SIZE, SLAB), lambda i: (0, 0)),         # w1 (resident)
            pl.BlockSpec((1, SLAB), lambda i: (0, 0)),                   # b1
            pl.BlockSpec((SLAB, SLAB), lambda i: (0, 0)),                # w2 (padded)
            pl.BlockSpec((1, SLAB), lambda i: (0, 0)),                   # b2 (padded)
            pl.BlockSpec((NUM_PROTOTYPES, SLAB), lambda i: (0, 0)),      # prototypes (padded)
        ],
        out_specs=pl.BlockSpec((TB, SLAB), lambda i: (i, 0)),
        compiler_params=pltpu.CompilerParams(
            dimension_semantics=("parallel",),
            vmem_limit_bytes=48 * 1024 * 1024),
        cost_estimate=cost,
    )(x, w1p, b1p, w2p, b2p, protos_p)

    feat = slab[:B, :PROTOTYPE_SIZE]
    out = slab[:B, PROTOTYPE_SIZE:PROTOTYPE_SIZE + NUM_CLASSES]
    return out, feat


def init_params(key):
    """Deterministic synthetic init matching the module's parameter shapes."""
    k1, k2, k3, k4, k5 = jax.random.split(key, 5)
    bound1 = 1.0 / (LATENT_SIZE ** 0.5)
    w1 = jax.random.uniform(k1, (LATENT_SIZE, PROTOTYPE_SIZE), jnp.float32,
                            -bound1, bound1)
    b1 = jax.random.uniform(k2, (1, PROTOTYPE_SIZE), jnp.float32, -bound1, bound1)
    bound2 = 1.0 / (PROTOTYPE_SIZE ** 0.5)
    w2 = jax.random.uniform(k3, (PROTOTYPE_SIZE, PROTOTYPE_SIZE), jnp.float32,
                            -bound2, bound2)
    b2 = jax.random.uniform(k4, (1, PROTOTYPE_SIZE), jnp.float32, -bound2, bound2)
    protos = jax.random.normal(k5, (NUM_PROTOTYPES, PROTOTYPE_SIZE), jnp.float32)
    return dict(w1=w1, b1=b1, w2=w2, b2=b2, protos=protos)


def ppnet_reference(x, p):
    """Pure-JAX mirror of the PyTorch forward (exact broadcast/two-pass forms)."""
    h = x @ p["w1"] + p["b1"]
    mean = jnp.mean(h, axis=-1, keepdims=True)
    var = jnp.mean((h - mean) ** 2, axis=-1, keepdims=True)
    h = (h - mean) / jnp.sqrt(var + EPS_INSTANCE_NORM)
    h = jnp.maximum(h, 0.0)
    z = h @ p["w2"] + p["b2"]
    diff = z[:, None, :] - p["protos"][None, :, :]
    l2s = jnp.sum(diff * diff, axis=-1)
    acts = jnp.log((l2s + 1.0) / (l2s + EPS_PROTO))
    w3 = jnp.array([[-1.0, 0.0, 0.0],
                    [1.0, 0.0, 0.0],
                    [0.0, 1.0, 0.0],
                    [0.0, 0.0, 1.0]], dtype=jnp.float32)
    logits = acts @ w3
    out = jnp.concatenate(
        [jnp.tanh(logits[:, :1]), jnp.maximum(logits[:, 1:], 0.0)], axis=1)
    return out, z


if __name__ == "__main__":
    key = jax.random.PRNGKey(0)
    kp, kx1, kx2, kx3 = jax.random.split(key, 4)
    params = init_params(kp)

    # small single-block case
    B1 = 8
    x1 = jax.random.normal(kx1, (B1, LATENT_SIZE), dtype=jnp.float32)
    out1, feat1 = ppnet_forward(x1, params)
    out1 = jax.block_until_ready(out1)
    feat1 = jax.block_until_ready(feat1)
    ref_out1, ref_feat1 = ppnet_reference(x1, params)
    assert out1.shape == (B1, NUM_CLASSES)
    assert feat1.shape == (B1, PROTOTYPE_SIZE)
    assert jnp.allclose(out1, ref_out1, atol=1e-4, rtol=1e-4)
    assert jnp.allclose(feat1, ref_feat1, atol=1e-4, rtol=1e-4)

    # multi-step grid case (exercises batch pipelining with resident weights)
    B2 = 24
    x2 = jax.random.normal(kx2, (B2, LATENT_SIZE), dtype=jnp.float32)
    out2, feat2 = ppnet_forward(x2, params, block_b=8)
    out2 = jax.block_until_ready(out2)
    feat2 = jax.block_until_ready(feat2)
    ref_out2, ref_feat2 = ppnet_reference(x2, params)
    assert jnp.allclose(out2, ref_out2, atol=1e-4, rtol=1e-4)
    assert jnp.allclose(feat2, ref_feat2, atol=1e-4, rtol=1e-4)

    # ragged batch with default tiling (exercises the minimal-padding /
    # >=2-step path that keeps both v7x TensorCores busy)
    B3 = 20
    x3 = jax.random.normal(kx3, (B3, LATENT_SIZE), dtype=jnp.float32)
    out3, feat3 = ppnet_forward(x3, params)
    out3 = jax.block_until_ready(out3)
    feat3 = jax.block_until_ready(feat3)
    ref_out3, ref_feat3 = ppnet_reference(x3, params)
    assert jnp.allclose(out3, ref_out3, atol=1e-4, rtol=1e-4)
    assert jnp.allclose(feat3, ref_feat3, atol=1e-4, rtol=1e-4)

    print("KERNEL_OK")
</pallas_src>

<mosaic_0001>
module attributes {stable_mosaic.version = 11 : i64} {
  func.func @ppnet_kernel(%arg0: i32, %arg1: memref<8x256xf32, #tpu.memory_space<vmem>>, %arg2: memref<256x128xf32, #tpu.memory_space<vmem>>, %arg3: memref<1x128xf32, #tpu.memory_space<vmem>>, %arg4: memref<128x128xf32, #tpu.memory_space<vmem>>, %arg5: memref<1x128xf32, #tpu.memory_space<vmem>>, %arg6: memref<4x128xf32, #tpu.memory_space<vmem>>, %arg7: memref<8x128xf32, #tpu.memory_space<vmem>>) attributes {dimension_semantics = [#tpu.dimension_semantics<parallel>], iteration_bounds = array<i64: 1>, scalar_prefetch = 0 : i64, scratch_operands = 0 : i64, tpu.core_type = #tpu.core_type<tc>, window_params = [{transform_indices = @transform_0, window_bounds = array<i64: 8, 256>}, {pipeline_mode = #tpu.pipeline_mode<synchronous>, transform_indices = @transform_1, window_bounds = array<i64: 256, 128>}, {pipeline_mode = #tpu.pipeline_mode<synchronous>, transform_indices = @transform_2, window_bounds = array<i64: 1, 128>}, {pipeline_mode = #tpu.pipeline_mode<synchronous>, transform_indices = @transform_3, window_bounds = array<i64: 128, 128>}, {pipeline_mode = #tpu.pipeline_mode<synchronous>, transform_indices = @transform_4, window_bounds = array<i64: 1, 128>}, {pipeline_mode = #tpu.pipeline_mode<synchronous>, transform_indices = @transform_5, window_bounds = array<i64: 4, 128>}, {transform_indices = @transform_6, window_bounds = array<i64: 8, 128>}]} {
    %c0 = arith.constant 0 : index
    %c0_0 = arith.constant 0 : index
    %0 = vector.load %arg1[%c0, %c0_0] : memref<8x256xf32, #tpu.memory_space<vmem>>, vector<8x256xf32>
    %c0_1 = arith.constant 0 : index
    %c0_2 = arith.constant 0 : index
    %1 = vector.load %arg2[%c0_1, %c0_2] : memref<256x128xf32, #tpu.memory_space<vmem>>, vector<256x128xf32>
    %cst = arith.constant dense<0.000000e+00> : vector<8x128xf32>
    %2 = tpu.matmul %0, %1, %cst {dimension_numbers = #tpu.dot_dimension_numbers<[1], [0], [0], [1], [0, 0, 1, 1], [], []>} : vector<8x256xf32>, vector<256x128xf32>, vector<8x128xf32> -> vector<8x128xf32>
    %c0_3 = arith.constant 0 : index
    %c0_4 = arith.constant 0 : index
    %3 = vector.load %arg3[%c0_3, %c0_4] : memref<1x128xf32, #tpu.memory_space<vmem>>, vector<1x128xf32>
    %4 = vector.broadcast %3 : vector<1x128xf32> to vector<8x128xf32>
    %5 = arith.addf %2, %4 : vector<8x128xf32>
    %6 = tpu.iota {dimensions = array<i32: 1>} : vector<1x128xi32>
    %c50_i32 = arith.constant 50 : i32
    %7 = vector.broadcast %c50_i32 : i32 to vector<1x128xi32>
    %8 = arith.cmpi slt, %6, %7 : vector<1x128xi32>
    %cst_5 = arith.constant dense<0.000000e+00> : vector<8xf32>
    %9 = vector.multi_reduction <add>, %5, %cst_5 [1] : vector<8x128xf32> to vector<8xf32>
    %10 = vector.shape_cast %9 : vector<8xf32> to vector<8x1xf32>
    %cst_6 = arith.constant 2.000000e-02 : f32
    %11 = vector.broadcast %cst_6 : f32 to vector<8x1xf32>
    %12 = arith.mulf %10, %11 : vector<8x1xf32>
    %13 = vector.broadcast %12 : vector<8x1xf32> to vector<8x128xf32>
    %14 = arith.subf %5, %13 : vector<8x128xf32>
    %cst_7 = arith.constant 0.000000e+00 : f32
    %15 = vector.shape_cast %8 : vector<1x128xi1> to vector<1x128xi1>
    %16 = vector.broadcast %15 : vector<1x128xi1> to vector<8x128xi1>
    %17 = vector.broadcast %cst_7 : f32 to vector<8x128xf32>
    %18 = arith.select %16, %14, %17 : vector<8x128xi1>, vector<8x128xf32>
    %19 = arith.mulf %18, %18 : vector<8x128xf32>
    %cst_8 = arith.constant dense<0.000000e+00> : vector<8xf32>
    %20 = vector.multi_reduction <add>, %19, %cst_8 [1] : vector<8x128xf32> to vector<8xf32>
    %21 = vector.shape_cast %20 : vector<8xf32> to vector<8x1xf32>
    %cst_9 = arith.constant 2.000000e-02 : f32
    %22 = vector.broadcast %cst_9 : f32 to vector<8x1xf32>
    %23 = arith.mulf %21, %22 : vector<8x1xf32>
    %cst_10 = arith.constant 9.99999974E-6 : f32
    %24 = vector.broadcast %cst_10 : f32 to vector<8x1xf32>
    %25 = arith.addf %23, %24 : vector<8x1xf32>
    %26 = math.rsqrt %25 : vector<8x1xf32>
    %27 = vector.broadcast %26 : vector<8x1xf32> to vector<8x128xf32>
    %28 = arith.mulf %18, %27 : vector<8x128xf32>
    %cst_11 = arith.constant 0.000000e+00 : f32
    %29 = vector.broadcast %cst_11 : f32 to vector<8x128xf32>
    %30 = arith.maximumf %28, %29 : vector<8x128xf32>
    %c0_12 = arith.constant 0 : index
    %c0_13 = arith.constant 0 : index
    %31 = vector.load %arg4[%c0_12, %c0_13] : memref<128x128xf32, #tpu.memory_space<vmem>>, vector<128x128xf32>
    %cst_14 = arith.constant dense<0.000000e+00> : vector<8x128xf32>
    %32 = tpu.matmul %30, %31, %cst_14 {dimension_numbers = #tpu.dot_dimension_numbers<[1], [0], [0], [1], [0, 0, 1, 1], [], []>} : vector<8x128xf32>, vector<128x128xf32>, vector<8x128xf32> -> vector<8x128xf32>
    %c0_15 = arith.constant 0 : index
    %c0_16 = arith.constant 0 : index
    %33 = vector.load %arg5[%c0_15, %c0_16] : memref<1x128xf32, #tpu.memory_space<vmem>>, vector<1x128xf32>
    %34 = vector.broadcast %33 : vector<1x128xf32> to vector<8x128xf32>
    %35 = arith.addf %32, %34 : vector<8x128xf32>
    %c0_17 = arith.constant 0 : index
    %c0_18 = arith.constant 0 : index
    %36 = vector.load %arg6[%c0_17, %c0_18] : memref<4x128xf32, #tpu.memory_space<vmem>>, vector<4x128xf32>
    %37 = vector.extract_strided_slice %36 {offsets = [0, 0], sizes = [1, 128], strides = [1, 1]} : vector<4x128xf32> to vector<1x128xf32>
    %38 = vector.broadcast %37 : vector<1x128xf32> to vector<8x128xf32>
    %39 = arith.subf %35, %38 : vector<8x128xf32>
    %40 = arith.mulf %39, %39 : vector<8x128xf32>
    %cst_19 = arith.constant dense<0.000000e+00> : vector<8xf32>
    %41 = vector.multi_reduction <add>, %40, %cst_19 [1] : vector<8x128xf32> to vector<8xf32>
    %42 = vector.shape_cast %41 : vector<8xf32> to vector<8x1xf32>
    %cst_20 = arith.constant 1.000000e+00 : f32
    %43 = vector.broadcast %cst_20 : f32 to vector<8x1xf32>
    %44 = arith.addf %42, %43 : vector<8x1xf32>
    %cst_21 = arith.constant 9.99999974E-6 : f32
    %45 = vector.broadcast %cst_21 : f32 to vector<8x1xf32>
    %46 = arith.addf %42, %45 : vector<8x1xf32>
    %47 = arith.divf %44, %46 : vector<8x1xf32>
    %48 = math.log %47 : vector<8x1xf32>
    %49 = vector.extract_strided_slice %36 {offsets = [1, 0], sizes = [1, 128], strides = [1, 1]} : vector<4x128xf32> to vector<1x128xf32>
    %50 = vector.broadcast %49 : vector<1x128xf32> to vector<8x128xf32>
    %51 = arith.subf %35, %50 : vector<8x128xf32>
    %52 = arith.mulf %51, %51 : vector<8x128xf32>
    %cst_22 = arith.constant dense<0.000000e+00> : vector<8xf32>
    %53 = vector.multi_reduction <add>, %52, %cst_22 [1] : vector<8x128xf32> to vector<8xf32>
    %54 = vector.shape_cast %53 : vector<8xf32> to vector<8x1xf32>
    %cst_23 = arith.constant 1.000000e+00 : f32
    %55 = vector.broadcast %cst_23 : f32 to vector<8x1xf32>
    %56 = arith.addf %54, %55 : vector<8x1xf32>
    %cst_24 = arith.constant 9.99999974E-6 : f32
    %57 = vector.broadcast %cst_24 : f32 to vector<8x1xf32>
    %58 = arith.addf %54, %57 : vector<8x1xf32>
    %59 = arith.divf %56, %58 : vector<8x1xf32>
    %60 = math.log %59 : vector<8x1xf32>
    %61 = vector.extract_strided_slice %36 {offsets = [2, 0], sizes = [1, 128], strides = [1, 1]} : vector<4x128xf32> to vector<1x128xf32>
    %62 = vector.broadcast %61 : vector<1x128xf32> to vector<8x128xf32>
    %63 = arith.subf %35, %62 : vector<8x128xf32>
    %64 = arith.mulf %63, %63 : vector<8x128xf32>
    %cst_25 = arith.constant dense<0.000000e+00> : vector<8xf32>
    %65 = vector.multi_reduction <add>, %64, %cst_25 [1] : vector<8x128xf32> to vector<8xf32>
    %66 = vector.shape_cast %65 : vector<8xf32> to vector<8x1xf32>
    %cst_26 = arith.constant 1.000000e+00 : f32
    %67 = vector.broadcast %cst_26 : f32 to vector<8x1xf32>
    %68 = arith.addf %66, %67 : vector<8x1xf32>
    %cst_27 = arith.constant 9.99999974E-6 : f32
    %69 = vector.broadcast %cst_27 : f32 to vector<8x1xf32>
    %70 = arith.addf %66, %69 : vector<8x1xf32>
    %71 = arith.divf %68, %70 : vector<8x1xf32>
    %72 = math.log %71 : vector<8x1xf32>
    %73 = vector.extract_strided_slice %36 {offsets = [3, 0], sizes = [1, 128], strides = [1, 1]} : vector<4x128xf32> to vector<1x128xf32>
    %74 = vector.broadcast %73 : vector<1x128xf32> to vector<8x128xf32>
    %75 = arith.subf %35, %74 : vector<8x128xf32>
    %76 = arith.mulf %75, %75 : vector<8x128xf32>
    %cst_28 = arith.constant dense<0.000000e+00> : vector<8xf32>
    %77 = vector.multi_reduction <add>, %76, %cst_28 [1] : vector<8x128xf32> to vector<8xf32>
    %78 = vector.shape_cast %77 : vector<8xf32> to vector<8x1xf32>
    %cst_29 = arith.constant 1.000000e+00 : f32
    %79 = vector.broadcast %cst_29 : f32 to vector<8x1xf32>
    %80 = arith.addf %78, %79 : vector<8x1xf32>
    %cst_30 = arith.constant 9.99999974E-6 : f32
    %81 = vector.broadcast %cst_30 : f32 to vector<8x1xf32>
    %82 = arith.addf %78, %81 : vector<8x1xf32>
    %83 = arith.divf %80, %82 : vector<8x1xf32>
    %84 = math.log %83 : vector<8x1xf32>
    %85 = arith.subf %60, %48 : vector<8x1xf32>
    %86 = math.tanh %85 : vector<8x1xf32>
    %cst_31 = arith.constant 0.000000e+00 : f32
    %87 = vector.broadcast %cst_31 : f32 to vector<8x1xf32>
    %88 = arith.maximumf %72, %87 : vector<8x1xf32>
    %cst_32 = arith.constant 0.000000e+00 : f32
    %89 = vector.broadcast %cst_32 : f32 to vector<8x1xf32>
    %90 = arith.maximumf %84, %89 : vector<8x1xf32>
    %c50_i32_33 = arith.constant 50 : i32
    %91 = vector.broadcast %c50_i32_33 : i32 to vector<1x128xi32>
    %92 = arith.cmpi eq, %6, %91 : vector<1x128xi32>
    %93 = vector.shape_cast %92 : vector<1x128xi1> to vector<1x128xi1>
    %94 = vector.broadcast %93 : vector<1x128xi1> to vector<8x128xi1>
    %95 = vector.shape_cast %86 : vector<8x1xf32> to vector<8x1xf32>
    %96 = vector.broadcast %95 : vector<8x1xf32> to vector<8x128xf32>
    %97 = arith.select %94, %96, %35 : vector<8x128xi1>, vector<8x128xf32>
    %c51_i32 = arith.constant 51 : i32
    %98 = vector.broadcast %c51_i32 : i32 to vector<1x128xi32>
    %99 = arith.cmpi eq, %6, %98 : vector<1x128xi32>
    %100 = vector.shape_cast %99 : vector<1x128xi1> to vector<1x128xi1>
    %101 = vector.broadcast %100 : vector<1x128xi1> to vector<8x128xi1>
    %102 = vector.shape_cast %88 : vector<8x1xf32> to vector<8x1xf32>
    %103 = vector.broadcast %102 : vector<8x1xf32> to vector<8x128xf32>
    %104 = arith.select %101, %103, %97 : vector<8x128xi1>, vector<8x128xf32>
    %c52_i32 = arith.constant 52 : i32
    %105 = vector.broadcast %c52_i32 : i32 to vector<1x128xi32>
    %106 = arith.cmpi eq, %6, %105 : vector<1x128xi32>
    %107 = vector.shape_cast %106 : vector<1x128xi1> to vector<1x128xi1>
    %108 = vector.broadcast %107 : vector<1x128xi1> to vector<8x128xi1>
    %109 = vector.shape_cast %90 : vector<8x1xf32> to vector<8x1xf32>
    %110 = vector.broadcast %109 : vector<8x1xf32> to vector<8x128xf32>
    %111 = arith.select %108, %110, %104 : vector<8x128xi1>, vector<8x128xf32>
    %c0_34 = arith.constant 0 : index
    %c0_35 = arith.constant 0 : index
    %112 = vector.load %arg7[%c0_34, %c0_35] : memref<8x128xf32, #tpu.memory_space<vmem>>, vector<8x128xf32>
    tpu.vector_store %arg7[%c0_34, %c0_35], %111 {strides = array<i32>} : memref<8x128xf32, #tpu.memory_space<vmem>>, vector<8x128xf32>,
    return
  }
  func.func @transform_0(%arg0: i32) -> (i32, i32) {
    %c0_i32 = arith.constant 0 : i32
    %c0_i32_0 = arith.constant 0 : i32
    return %arg0, %c0_i32 : i32, i32
  }
  func.func @transform_1(%arg0: i32) -> (i32, i32) {
    %c0_i32 = arith.constant 0 : i32
    %c0_i32_0 = arith.constant 0 : i32
    %c0_i32_1 = arith.constant 0 : i32
    return %c0_i32, %c0_i32_0 : i32, i32
  }
  func.func @transform_2(%arg0: i32) -> (i32, i32) {
    %c0_i32 = arith.constant 0 : i32
    %c0_i32_0 = arith.constant 0 : i32
    %c0_i32_1 = arith.constant 0 : i32
    return %c0_i32, %c0_i32_0 : i32, i32
  }
  func.func @transform_3(%arg0: i32) -> (i32, i32) {
    %c0_i32 = arith.constant 0 : i32
    %c0_i32_0 = arith.constant 0 : i32
    %c0_i32_1 = arith.constant 0 : i32
    return %c0_i32, %c0_i32_0 : i32, i32
  }
  func.func @transform_4(%arg0: i32) -> (i32, i32) {
    %c0_i32 = arith.constant 0 : i32
    %c0_i32_0 = arith.constant 0 : i32
    %c0_i32_1 = arith.constant 0 : i32
    return %c0_i32, %c0_i32_0 : i32, i32
  }
  func.func @transform_5(%arg0: i32) -> (i32, i32) {
    %c0_i32 = arith.constant 0 : i32
    %c0_i32_0 = arith.constant 0 : i32
    %c0_i32_1 = arith.constant 0 : i32
    return %c0_i32, %c0_i32_0 : i32, i32
  }
  func.func @transform_6(%arg0: i32) -> (i32, i32) {
    %c0_i32 = arith.constant 0 : i32
    %c0_i32_0 = arith.constant 0 : i32
    return %arg0, %c0_i32 : i32, i32
  }
}

</mosaic_0001>

<bundles_post_ra>
// kernel: tpu_custom_call.1
= control target key start
LH: loop header
LB: loop body
LE: loop exit
PB: predicated region body
PF: predicated region fallthrough
CT: control target
= control target key end

     0   :  { %11 = vsyncpa [#allocation3], 0  ;;  %s655_s0 = inlined_call_operand.hbm [shape: f32[8,256], index: 0, kind: input, shape index: {}]   ;;  %s656_s1 = inlined_call_operand.hbm [shape: f32[256,128], index: 1, kind: input, shape index: {}]   ;;  %s657_s2 = inlined_call_operand.vmem [shape: f32[1,128], index: 2, kind: input, shape index: {}]   ;;  %s658_s3 = inlined_call_operand.hbm [shape: f32[128,128], index: 3, kind: input, shape index: {}]   ;;  %s659_s4 = inlined_call_operand.vmem [shape: f32[1,128], index: 4, kind: input, shape index: {}]   ;;  %s660_s5 = inlined_call_operand.vmem [shape: f32[4,128], index: 5, kind: input, shape index: {}]   ;;  %s661_s6 = inlined_call_operand.hbm [shape: f32[8,128], index: 6, kind: output, shape index: {}]  }
   0x1   :  { %12 = vsyncpa [#allocation6], 0 }
   0x2   :  { %13 = vsyncpa [#allocation4], 0  ;;  %s578_s21 = smov [#allocation5]  }
   0x3   :  { %s29_s22 = sshll.u32 %s578_s21, 4  ;;  %s30_s22 = int_to_ptr.vmem [resolvable:$true] %s29_s22 }
   0x4   :  { %s500_s23 = scalar_lea.vmem %s30_s22, 4096  ;;  %p505_p1 = scmp.lt.s32.totalorder %s30_s22, %s30_s22 }
   0x5   :  { %p501_p0 = scmp.ne.s32.totalorder %s30_s22, %s500_s23  ;;  %p506_p2 = scmp.lt.s32.totalorder %s500_s23, %s500_s23 }
   0x7   :  { %p507_p3 = por %p506_p2, %p505_p1 }
   0x9   :  { %p508_p4 = pnand %p507_p3, %p501_p0 }
   0xb   :  { %511 = shalt.err (!%p508_p4)
}
   0xc   :  { %s579_s24 = smov 128   ;;  %s580_s25 = smov 8  }
   0xd   :  { %35 = dma.hbm_to_vmem [thread:$0]  %s656_s1, 4096, %s30_s22, [#allocation6], %s579_s24, %s579_s24, %s580_s25  }
   0xe   :  { %s581_s28 = smov [#allocation2]   ;;  %s582_s30 = smov [#allocation7]  }
   0xf   :  { %s20_s29 = sshll.u32 %s581_s28, 4  ;;  %s43_s7 = sshll.u32 %s582_s30, 4  ;;  %s21_s29 = int_to_ptr.vmem [resolvable:$true] %s20_s29  ;;  %s44_s7 = int_to_ptr.vmem [resolvable:$true] %s43_s7 }
  0x10   :  { %s520_s8 = scalar_lea.vmem %s21_s29, 256  ;;  %p525_p6 = scmp.lt.s32.totalorder %s21_s29, %s21_s29 }
  0x11   :  { %p521_p5 = scmp.ne.s32.totalorder %s21_s29, %s520_s8  ;;  %p526_p7 = scmp.lt.s32.totalorder %s520_s8, %s520_s8 }
  0x13   :  { %p527_p8 = por %p526_p7, %p525_p6 }
  0x15   :  { %p528_p9 = pnand %p527_p8, %p521_p5 }
  0x17   :  { %531 = shalt.err (!%p528_p9)
}
  0x18   :  { %23 = dma.hbm_to_vmem [thread:$0]  %s655_s0, 256, %s21_s29, [#allocation3]  }
  0x19   :  { %s540_s11 = scalar_lea.vmem %s44_s7, 2048  ;;  %p545_p11 = scmp.lt.s32.totalorder %s44_s7, %s44_s7 }
  0x1a   :  { %p541_p10 = scmp.ne.s32.totalorder %s44_s7, %s540_s11  ;;  %p546_p12 = scmp.lt.s32.totalorder %s540_s11, %s540_s11 }
  0x1c   :  { %p547_p13 = por %p546_p12, %p545_p11 }
  0x1e   :  { %p548_p0 = pnand %p547_p13, %p541_p10 }
  0x20   :  { %551 = shalt.err (!%p548_p0)
}
  0x21   :  { %49 = dma.hbm_to_vmem [thread:$0]  %s658_s3, 2048, %s44_s7, [#allocation6], %s579_s24, %s579_s24, %s580_s25  }
  0x22   :  { %572 = dma.done.wait [#allocation3], 256  }
  0x23   :  { %573 = vsyncadd [#allocation3], 4294967040 }
  0x24   :  { %574 = dma.done.wait [#allocation6], 6144  }
  0x25   :  { %575 = vsyncadd [#allocation6], 4294961152  ;;  %v96_v0 = vld [vmem:[#allocation5 + $0xf8] sm:$0xff]  ;;  %v95_v2 = vld [vmem:[#allocation5 + $0xf0] sm:$0xff]  ;;  %v583_v40 = vmov 0.0   ;;  %v174_v45 = vlaneseq  ;;  %vm584_vm1 = vmmov 0  }
  0x26   :  { %v80_v1 = vld [vmem:[#allocation5 + $0x78] sm:$0xff]  ;;  %377 = vmatprep.subr.mxu0 %v96_v0  ;;  %v79_v3 = vld [vmem:[#allocation5 + $0x70] sm:$0xff]  ;;  %v94_v4 = vld [vmem:[#allocation5 + $0xe8] sm:$0xff]  ;;  %429 = vmatprep.subr.mxu1 %v583_v40 }
  0x27   :  { %378 = vmatpush3.msra.mxu0 %v80_v1  ;;  %v78_v5 = vld [vmem:[#allocation5 + $0x68] sm:$0xff]  ;;  %v93_v6 = vld [vmem:[#allocation5 + $0xe0] sm:$0xff]  ;;  %v92_v8 = vld [vmem:[#allocation5 + $0xd8] sm:$0xff]  ;;  %v633_v46 = vand.u32 127, %v174_v45  ;;  %461 = vmatprep.mubr.msk.f32.mxu1 %vm584_vm1, %v583_v40 }
  0x28   :  { %379 = vmatprep.subr.mxu0 %v95_v2  ;;  %v77_v7 = vld [vmem:[#allocation5 + $0x60] sm:$0xff]  ;;  %v76_v9 = vld [vmem:[#allocation5 + $0x58] sm:$0xff]  ;;  %v91_v10 = vld [vmem:[#allocation5 + $0xd0] sm:$0xff] }
  0x29   :  { %380 = vmatpush3.msra.mxu0 %v79_v3  ;;  %v75_v11 = vld [vmem:[#allocation5 + $0x50] sm:$0xff]  ;;  %v90_v12 = vld [vmem:[#allocation5 + $0xc8] sm:$0xff]  ;;  %v64_v13 = vld [vmem:[#allocation2 + $0x8] sm:$0xff]  ;;  %vm176_vm0 = vcmp.lt.s32.totalorder %v633_v46, 50  ;;  %vm346_vm2 = vcmp.eq.s32.totalorder %v633_v46, 50  ;;  %vm350_vm3 = vcmp.eq.s32.totalorder %v633_v46, 51 }
  0x2a   :  { %381 = vmatprep.subr.mxu0 %v94_v4  ;;  %v74_v14 = vld [vmem:[#allocation5 + $0x48] sm:$0xff]  ;;  %168 = vmatprep.mubr.f32.mxu0 %v64_v13  ;;  %v89_v15 = vld [vmem:[#allocation5 + $0xc0] sm:$0xff]  ;;  %v88_v17 = vld [vmem:[#allocation5 + $0xb8] sm:$0xff]  ;;  %vm354_vm4 = vcmp.eq.s32.totalorder %v633_v46, 52 }
  0x2b   :  { %382 = vmatpush3.msra.mxu0 %v78_v5  ;;  %v73_v16 = vld [vmem:[#allocation5 + $0x40] sm:$0xff]  ;;  %v72_v18 = vld [vmem:[#allocation5 + $0x38] sm:$0xff]  ;;  %v87_v19 = vld [vmem:[#allocation5 + $0xb0] sm:$0xff]  ;;  %v287_v5 = vshrl.u32 %v174_v45, 7 }
  0x2c   :  { %383 = vmatprep.subr.mxu0 %v93_v6  ;;  %v71_v20 = vld [vmem:[#allocation5 + $0x30] sm:$0xff]  ;;  %v86_v21 = vld [vmem:[#allocation5 + $0xa8] sm:$0xff]  ;;  %v85_v23 = vld [vmem:[#allocation5 + $0xa0] sm:$0xff] }
  0x2d   :  { %384 = vmatpush3.msra.mxu0 %v77_v7  ;;  %v70_v22 = vld [vmem:[#allocation5 + $0x28] sm:$0xff]  ;;  %v69_v24 = vld [vmem:[#allocation5 + $0x20] sm:$0xff]  ;;  %v84_v25 = vld [vmem:[#allocation5 + $0x98] sm:$0xff]  ;;  %v316_v6 = vsub.s32 2, %v287_v5  ;;  %v288_v7 = vsub.s32 0, %v287_v5 }
  0x2e   :  { %385 = vmatprep.subr.mxu0 %v92_v8  ;;  %v68_v26 = vld [vmem:[#allocation5 + $0x18] sm:$0xff]  ;;  %v83_v27 = vld [vmem:[#allocation5 + $0x90] sm:$0xff]  ;;  %v82_v29 = vld [vmem:[#allocation5 + $0x88] sm:$0xff] }
  0x2f   :  { %386 = vmatpush3.msra.mxu0 %v76_v9  ;;  %v67_v28 = vld [vmem:[#allocation5 + $0x10] sm:$0xff]  ;;  %v66_v30 = vld [vmem:[#allocation5 + $0x8] sm:$0xff]  ;;  %v81_v31 = vld [vmem:[#allocation5 + $0x80] sm:$0xff]  ;;  %v302_v9 = vsub.s32 1, %v287_v5 }
  0x30   :  { %387 = vmatprep.subr.mxu0 %v91_v10  ;;  %v65_v32 = vld [vmem:[#allocation5] sm:$0xff]  ;;  %v63_v33 = vld [vmem:[#allocation2] sm:$0xff]  ;;  %v207_v39 = vld [vmem:[#allocation7 + $0x78] sm:$0xff] }
  0x31   :  { %388 = vmatpush3.msra.mxu0 %v75_v11  ;;  %v375_v36 = vld [vmem:[%s657_s2] ss:$0 sm:$0xff]  ;;  %430 = vmatpush3.msra.mxu1 %v207_v39  ;;  %v205_v42 = vld [vmem:[#allocation7 + $0x68] sm:$0xff]  ;;  %v204_v43 = vld [vmem:[#allocation7 + $0x60] sm:$0xff] }
  0x32   :  { %389 = vmatprep.subr.mxu0 %v90_v12  ;;  %v206_v41 = vld [vmem:[#allocation7 + $0x70] sm:$0xff]  ;;  %431 = vmatprep.subr.mxu1 %v583_v40  ;;  %v203_v44 = vld [vmem:[#allocation7 + $0x58] sm:$0xff]  ;;  %v201_v53 = vld [vmem:[#allocation7 + $0x48] sm:$0xff] }
  0x33   :  { %390 = vmatpush3.msra.mxu0 %v74_v14  ;;  %432 = vmatpush3.msra.mxu1 %v206_v41  ;;  %v202_v52 = vld [vmem:[#allocation7 + $0x50] sm:$0xff]  ;;  %v200_v54 = vld [vmem:[#allocation7 + $0x40] sm:$0xff]  ;;  %v199_v55 = vld [vmem:[#allocation7 + $0x38] sm:$0xff] }
  0x34   :  { %391 = vmatprep.subr.mxu0 %v89_v15  ;;  %433 = vmatprep.subr.mxu1 %v583_v40  ;;  %v198_v56 = vld [vmem:[#allocation7 + $0x30] sm:$0xff]  ;;  %v197_v57 = vld [vmem:[#allocation7 + $0x28] sm:$0xff]  ;;  %v196_v58 = vld [vmem:[#allocation7 + $0x20] sm:$0xff] }
  0x35   :  { %392 = vmatpush3.msra.mxu0 %v73_v16  ;;  %434 = vmatpush3.msra.mxu1 %v205_v42  ;;  %v195_v59 = vld [vmem:[#allocation7 + $0x18] sm:$0xff]  ;;  %v194_v60 = vld [vmem:[#allocation7 + $0x10] sm:$0xff]  ;;  %v193_v61 = vld [vmem:[#allocation7 + $0x8] sm:$0xff]  ;;  %v330_v16 = vsub.s32 3, %v287_v5 }
  0x36   :  { %393 = vmatprep.subr.mxu0 %v88_v17  ;;  %435 = vmatprep.subr.mxu1 %v583_v40  ;;  %v192_v62 = vld [vmem:[#allocation7] sm:$0xff]  ;;  %v285_v8 = vld [vmem:[%s660_s5] sm:$0xf] }
  0x37   :  { %394 = vmatpush3.msra.mxu0 %v72_v18  ;;  %436 = vmatpush3.msra.mxu1 %v204_v43  ;;  %v376_v10 = vld [vmem:[%s659_s4] ss:$0 sm:$0xff]  ;;  %v317_v11 = vrot.slane %v285_v8, %v316_v6  ;;  %v289_v12 = vrot.slane %v285_v8, %v288_v7  ;;  %v303_v15 = vrot.slane %v285_v8, %v302_v9  ;;  %s585_s4 = smov [#allocation8]  }
  0x38   :  { %395 = vmatprep.subr.mxu0 %v87_v19  ;;  %437 = vmatprep.subr.mxu1 %v583_v40  ;;  %s365_s5 = sshll.u32 %s585_s4, 4  ;;  %s366_s5 = int_to_ptr.vmem [resolvable:$true] %s365_s5 }
  0x39   :  { %396 = vmatpush3.msra.mxu0 %v71_v20  ;;  %438 = vmatpush3.msra.mxu1 %v203_v44  ;;  %s552_s16 = scalar_lea.vmem %s366_s5, 128  ;;  %p557_p2 = scmp.lt.s32.totalorder %s366_s5, %s366_s5 }
  0x3a   :  { %397 = vmatprep.subr.mxu0 %v86_v21  ;;  %439 = vmatprep.subr.mxu1 %v583_v40  ;;  %p553_p1 = scmp.ne.s32.totalorder %s366_s5, %s552_s16  ;;  %p558_p3 = scmp.lt.s32.totalorder %s552_s16, %s552_s16 }
  0x3b   :  { %398 = vmatpush3.msra.mxu0 %v70_v22  ;;  %440 = vmatpush3.msra.mxu1 %v202_v52 }
  0x3c   :  { %399 = vmatprep.subr.mxu0 %v85_v23  ;;  %441 = vmatprep.subr.mxu1 %v583_v40  ;;  %v331_v23 = vrot.slane %v285_v8, %v330_v16  ;;  %p559_p4 = por %p558_p3, %p557_p2 }
  0x3d   :  { %400 = vmatpush3.msra.mxu0 %v69_v24  ;;  %442 = vmatpush3.msra.mxu1 %v201_v53 }
  0x3e   :  { %401 = vmatprep.subr.mxu0 %v84_v25  ;;  %443 = vmatprep.subr.mxu1 %v583_v40  ;;  %p560_p5 = pnand %p559_p4, %p553_p1 }
  0x3f   :  { %402 = vmatpush3.msra.mxu0 %v68_v26  ;;  %444 = vmatpush3.msra.mxu1 %v200_v54 }
  0x40   :  { %403 = vmatprep.subr.mxu0 %v83_v27  ;;  %445 = vmatprep.subr.mxu1 %v583_v40 }
  0x41   :  { %404 = vmatpush3.msra.mxu0 %v67_v28  ;;  %446 = vmatpush3.msra.mxu1 %v199_v55 }
  0x42   :  { %405 = vmatprep.subr.mxu0 %v82_v29  ;;  %447 = vmatprep.subr.mxu1 %v583_v40 }
  0x43   :  { %406 = vmatpush3.msra.mxu0 %v66_v30  ;;  %448 = vmatpush3.msra.mxu1 %v198_v56 }
  0x44   :  { %407 = vmatprep.subr.mxu0 %v81_v31  ;;  %449 = vmatprep.subr.mxu1 %v583_v40 }
  0x45   :  { %408 = vmatpush3.msra.mxu0 %v65_v32  ;;  %450 = vmatpush3.msra.mxu1 %v197_v57 }
  0x46   :  { %169 = vmatmul.mubr.f32.vlgmr.msra.gmra.mxu0 %v63_v33  ;;  %451 = vmatprep.subr.mxu1 %v583_v40 }
  0x47   :  { %452 = vmatpush3.msra.mxu1 %v196_v58 }
  0x48   :  { %453 = vmatprep.subr.mxu1 %v583_v40 }
  0x49   :  { %454 = vmatpush3.msra.mxu1 %v195_v59 }
  0x4a   :  { %455 = vmatprep.subr.mxu1 %v583_v40 }
  0x4b   :  { %456 = vmatpush3.msra.mxu1 %v194_v60 }
  0x4c   :  { %457 = vmatprep.subr.mxu1 %v583_v40 }
  0x4d   :  { %458 = vmatpush3.msra.mxu1 %v193_v61 }
  0x4e   :  { %459 = vmatprep.subr.mxu1 %v583_v40 }
  0x4f   :  { %460 = vmatpush3.msra.mxu1 %v192_v62 }
 0x106   :  { %v409_v34 = vpop.f32.mrf.mxu0 }
 0x108   :  { %v410_v35 = vpop.f32.mrf.mxu0 }
 0x109   :  { %v411_v37 = vadd.f32 %v410_v35, %v409_v34 }
 0x10b   :  { %v171_v38 = vadd.f32 %v411_v37, %v375_v36 }
 0x10d   :  { %177 = vadd.xlane.f32.xlu0 %v171_v38 }
 0x196   :  { %v178_v47 = vpop.xlane.xlu0 %177 }
 0x197   :  { %v179_v48 = vmul.f32 0.02, %v178_v47 }
 0x199   :  { %v180_v49 = vsub.f32 %v171_v38, %v179_v48 }
 0x19b   :  { %v183_v50 = vsel %vm176_vm0, %v180_v49, 0.0 }
 0x19c   :  { %v184_v51 = vmul.f32 %v183_v50, %v183_v50 }
 0x19e   :  { %185 = vadd.xlane.f32.xlu0 %v184_v51 }
 0x227   :  { %v186_v63 = vpop.xlane.xlu0 %185 }
 0x228   :  { %v187_v0 = vmul.f32 0.02, %v186_v63 }
 0x22a   :  { %v188_v1 = vadd.f32 1e-05, %v187_v0 }
 0x22c   :  { %472 = vrsqrt.f32 %v188_v1 }
 0x239   :  { %v473_v2 = vpop.eup %472 }
 0x23a   :  { %v190_v3 = vmul.f32 %v473_v2, %v183_v50 }
 0x23c   :  { %v191_v4 = vmax.f32 %v190_v3, 0.0 }
 0x23e   :  { %462 = vmatmul.mubr.f32.vlgmr.msra.gmra.mxu1 %v191_v4 }
 0x2fe   :  { %v281_v13 = vpop.f32.mrf.mxu1 }
 0x2ff   :  { %v642_v14 = vadd.f32 %v376_v10, %v281_v13 }
 0x300   :  { %v463_v17 = vpop.f32.mrf.mxu1 }
 0x301   :  { %v318_v18 = vsub.f32 %v642_v14, %v317_v11  ;;  %v290_v19 = vsub.f32 %v642_v14, %v289_v12  ;;  %v304_v22 = vsub.f32 %v642_v14, %v303_v15  ;;  %v332_v25 = vsub.f32 %v642_v14, %v331_v23 }
 0x303   :  { %v319_v20 = vmul.f32 %v318_v18, %v318_v18  ;;  %v291_v21 = vmul.f32 %v290_v19, %v290_v19  ;;  %v305_v24 = vmul.f32 %v304_v22, %v304_v22  ;;  %v333_v26 = vmul.f32 %v332_v25, %v332_v25 }
 0x305   :  { %320 = vadd.xlane.f32.xlu0 %v319_v20  ;;  %292 = vadd.xlane.f32.xlu1 %v291_v21 }
 0x309   :  { %306 = vadd.xlane.f32.xlu1 %v305_v24 }
 0x30d   :  { %334 = vadd.xlane.f32.xlu1 %v333_v26 }
 0x38e   :  { %v293_v27 = vpop.xlane.xlu1 %292  ;;  %v321_v31 = vpop.xlane.xlu0 %320 }
 0x38f   :  { %v295_v28 = vadd.f32 1e-05, %v293_v27  ;;  %v323_v33 = vadd.f32 1e-05, %v321_v31  ;;  %v294_v35 = vadd.f32 1.0, %v293_v27  ;;  %v322_v43 = vadd.f32 1.0, %v321_v31 }
 0x391   :  { %474 = vrcp.f32 %v295_v28 }
 0x392   :  { %v307_v29 = vpop.xlane.xlu1 %306 }
 0x393   :  { %v309_v30 = vadd.f32 1e-05, %v307_v29  ;;  %v308_v38 = vadd.f32 1.0, %v307_v29 }
 0x395   :  { %476 = vrcp.f32 %v309_v30 }
 0x396   :  { %v335_v32 = vpop.xlane.xlu1 %334  ;;  %478 = vrcp.f32 %v323_v33 }
 0x397   :  { %v337_v34 = vadd.f32 1e-05, %v335_v32  ;;  %v336_v44 = vadd.f32 1.0, %v335_v32 }
 0x399   :  { %480 = vrcp.f32 %v337_v34 }
 0x39e   :  { %v475_v36 = vpop.eup %474 }
 0x39f   :  { %v297_v37 = vmul.f32 %v475_v36, %v294_v35 }
 0x3a1   :  { %482 = vlog2.f32 %v297_v37 }
 0x3a2   :  { %v477_v39 = vpop.eup %476 }
 0x3a3   :  { %v311_v40 = vmul.f32 %v477_v39, %v308_v38  ;;  %v479_v41 = vpop.eup %478 }
 0x3a4   :  { %v325_v45 = vmul.f32 %v479_v41, %v322_v43 }
 0x3a5   :  { %484 = vlog2.f32 %v311_v40 }
 0x3a6   :  { %v481_v42 = vpop.eup %480  ;;  %486 = vlog2.f32 %v325_v45 }
 0x3a7   :  { %v339_v47 = vmul.f32 %v481_v42, %v336_v44 }
 0x3a9   :  { %488 = vlog2.f32 %v339_v47 }
 0x3ae   :  { %v483_v48 = vpop.eup %482 }
 0x3af   :  { %v299_v50 = vmul.f32 0.6931472, %v483_v48 }
 0x3b2   :  { %v485_v49 = vpop.eup %484 }
 0x3b3   :  { %v313_v51 = vmul.f32 0.6931472, %v485_v49  ;;  %v487_v53 = vpop.eup %486 }
 0x3b4   :  { %v327_v55 = vmul.f32 0.6931472, %v487_v53 }
 0x3b5   :  { %v342_v52 = vsub.f32 %v313_v51, %v299_v50 }
 0x3b6   :  { %v489_v54 = vpop.eup %488  ;;  %v344_v58 = vmax.f32 %v327_v55, 0.0 }
 0x3b7   :  { %490 = vtanh.f32 %v342_v52  ;;  %v341_v56 = vmul.f32 0.6931472, %v489_v54 }
 0x3b9   :  { %v345_v59 = vmax.f32 %v341_v56, 0.0 }
 0x3c4   :  { %v491_v57 = vpop.eup %490 }
 0x3c5   :  { %v349_v60 = vsel %vm346_vm2, %v491_v57, %v642_v14 }
 0x3c6   :  { %v353_v61 = vsel %vm350_vm3, %v344_v58, %v349_v60 }
 0x3c7   :  { %v357_v62 = vsel %vm354_vm4, %v345_v59, %v353_v61 }
 0x3c8   :  { %358 = vst [vmem:[#allocation8] sm:$0xff] %v357_v62 }
 0x3c9   :  { %563 = shalt.err (!%p560_p5)
}
 0x3ca   :  { %368 = dma.vmem_to_hbm [thread:$0]  %s366_s5, 128, %s661_s6, [#allocation4]  }
 0x3cb   :  { %576 = dma.done.wait [#allocation4], 128  }
 0x3cc   :  { %577 = vsyncadd [#allocation4], 4294967168 }
 0x3cd   :  { %372 = vsyncpa [#allocation3], 1 }
 0x3ce   :  { %373 = vsyncpa [#allocation6], 1 }
 0x3cf   :  { %374 = vsyncpa [#allocation4], 1 }

</bundles_post_ra>
